<compile_context>
chip_gen: v7x
topology: tpu7x:2x2x1
jax: 0.10.0
libtpu: 0.0.40
codegen_flags: <defaults>
</compile_context>

<pallas_src>
import math

import jax
import jax.numpy as jnp
from jax.experimental import pallas as pl
from jax.experimental.pallas import tpu as pltpu


# --------------------------------------------------------------------------- helpers
def _round_up(x, m):
    return ((x + m - 1) // m) * m


def _cdiv(a, b):
    return (a + b - 1) // b


def _chip_info():
    """(vmem_capacity_bytes, tensorcores_per_chip) with conservative fallbacks."""
    vmem = None
    try:
        vmem = int(pltpu.get_tpu_info().vmem_capacity_bytes)
    except Exception:
        vmem = None
    kind = ""
    try:
        kind = jax.devices()[0].device_kind.lower()
    except Exception:
        pass
    is_v7 = ("v7" in kind) or (vmem is not None and vmem <= (96 << 20))
    if vmem is None:
        vmem = (64 << 20) if is_v7 else (128 << 20)
    return vmem, (2 if is_v7 else 1)


def _activation_fn(activation):
    if activation == "tanh":
        return jnp.tanh
    if activation == "relu":
        return lambda y: jnp.maximum(y, 0.0)
    if activation == "sigmoid":
        return jax.nn.sigmoid
    raise ValueError(f"Unknown Activation function: {activation}")


# --------------------------------------------------------------------------- kernels
def _make_simple_kernel(activation, compute_dtype):
    """K fits in one grid step: y = act(x @ W + b) directly from the MXU result."""
    act = _activation_fn(activation)

    def kernel(x_ref, w_ref, b_ref, o_ref):
        y = jnp.dot(x_ref[...].astype(compute_dtype), w_ref[...],
                    preferred_element_type=jnp.float32)
        # Dropout(p=0.0) is the identity (and identity in eval mode regardless).
        # TODO(synk): dropout_rate > 0 in training mode needs pltpu.prng_seed +
        #             pltpu.stateful_bernoulli masking and a 1/(1-p) rescale.
        o_ref[...] = act(y + b_ref[...]).astype(o_ref.dtype)

    return kernel


def _make_acc_kernel(activation, compute_dtype):
    """K tiled: f32 accumulator scratch; bias folded into the first partial sum."""
    act = _activation_fn(activation)

    def kernel(x_ref, w_ref, b_ref, o_ref, acc_ref):
        k = pl.program_id(2)
        part = jnp.dot(x_ref[...].astype(compute_dtype), w_ref[...],
                       preferred_element_type=jnp.float32)

        @pl.when(k == 0)
        def _():
            acc_ref[...] = part + b_ref[...]     # init with bias: no zero-fill store

        @pl.when(k > 0)
        def _():
            acc_ref[...] += part

        @pl.when(k == pl.num_programs(2) - 1)
        def _():
            o_ref[...] = act(acc_ref[...]).astype(o_ref.dtype)

    return kernel


# --------------------------------------------------------------------------- params
def prepare_fc_params(weight, bias, *, compute_dtype=jnp.bfloat16, lane_multiple=128):
    """One-time prep (kept OUT of the hot path): transpose torch (OUT, IN) weight to
    (IN, OUT), zero-pad OUT up to a multiple of 128 (lane-dense output), cast weight
    to bf16 (MXU native rate); bias stays f32 for the f32 epilogue."""
    out_f, in_f = weight.shape
    out_pad = _round_up(out_f, lane_multiple)
    w_t = jnp.zeros((in_f, out_pad), compute_dtype)
    w_t = w_t.at[:, :out_f].set(weight.T.astype(compute_dtype))
    b2 = jnp.zeros((1, out_pad), jnp.float32)
    b2 = b2.at[:, :out_f].set(bias.astype(jnp.float32))
    return w_t, b2, out_f


# --------------------------------------------------------------------------- forward
def fc_module_forward(x, w_t, b2, out_features, *, activation="tanh",
                      tile_b=None, tile_n=None, tile_k=None, out_dtype=None):
    """x: (B, IN); w_t: (IN, OUT_PAD) bf16 (pre-transposed/padded); b2: (1, OUT_PAD) f32."""
    B, IN = x.shape
    in_w, OUT_PAD = w_t.shape
    assert IN == in_w and b2.shape == (1, OUT_PAD)
    out_dtype = x.dtype if out_dtype is None else out_dtype
    compute_dtype = w_t.dtype

    vmem_bytes, n_tc = _chip_info()
    is_small_vmem = vmem_bytes <= (96 << 20)            # v7x: 64 MiB per TC
    vmem_cap = (48 << 20) if is_small_vmem else (104 << 20)
    vmem_hard = (56 << 20) if is_small_vmem else (112 << 20)

    w_item = jnp.dtype(compute_dtype).itemsize
    out_item = jnp.dtype(out_dtype).itemsize
    w_bytes = IN * OUT_PAD * w_item
    resident = w_bytes <= vmem_bytes // 4               # whole weight lives in VMEM

    # ---- N tiling (always lane-dense: multiple of 128 or full OUT_PAD) -------------
    if tile_n is None:
        if resident or OUT_PAD <= 512:
            tile_n = OUT_PAD
        else:
            tile_n = next(c for c in (512, 256, 128) if OUT_PAD % c == 0)
    assert OUT_PAD % tile_n == 0 and (tile_n % 128 == 0 or tile_n == OUT_PAD)

    # ---- K tiling (whole reduction unless IN is very large and not resident) -------
    if tile_k is None:
        if resident or IN <= 2048:
            tile_k = IN
        else:
            tile_k = next((c for c in (1024, 896, 768, 640, 512, 384, 256)
                           if IN % c == 0), IN)
    assert IN % tile_k == 0 and (tile_k % 128 == 0 or tile_k == IN)

    n_grid = OUT_PAD // tile_n
    k_grid = IN // tile_k

    # ---- M (batch) tiling: big tiles; ragged batches handled by masked edge blocks --
    if tile_b is None:
        if B <= 16:
            tile_b = B if B % 8 == 0 else _round_up(B, 8)
        else:
            tile_b = min(512, _round_up(B, 16))         # 16-row granule for bf16 vregs
        # v7x only (2 TensorCores): make sure both cores get at least one tile.
        if n_tc == 2 and B >= 32 and _cdiv(B, tile_b) * n_grid < 2:
            tile_b = _round_up(_cdiv(_round_up(B, 16), 2), 16)

    # bf16-cast x in the kernel unless x is genuinely re-streamed from HBM
    # (K-tiled path with more than one N tile re-reads each x tile n_grid times).
    precast = (k_grid > 1) and (n_grid > 1)
    x_in = x.astype(compute_dtype) if precast else x
    x_item = jnp.dtype(x_in.dtype).itemsize

    def vmem_need(tb):
        return (2 * tb * tile_k * x_item                 # x tile, double buffered
                + 2 * tile_k * tile_n * w_item           # weight tile, double buffered
                + 2 * tile_n * 4                         # bias tile
                + 2 * tb * tile_n * out_item             # output tile, double buffered
                + (tb * tile_n * 4 if k_grid > 1 else 0))  # f32 accumulator scratch

    while vmem_need(tile_b) > vmem_cap and tile_b > 16:
        tile_b = max(16, _round_up(tile_b // 2, 16))

    m_grid = _cdiv(B, tile_b)
    vmem_limit = min(vmem_hard, max(32 << 20, int(vmem_need(tile_b) * 1.5) + (1 << 20)))

    cost = pl.CostEstimate(
        flops=2 * B * IN * OUT_PAD,
        transcendentals=0 if activation == "relu" else B * OUT_PAD,
        bytes_accessed=(B * IN * x_item
                        + IN * OUT_PAD * w_item * (1 if (resident or n_grid == 1) else m_grid)
                        + OUT_PAD * 4
                        + B * OUT_PAD * out_item),
    )

    if k_grid == 1:
        # Whole-K path (the common case, and always when the weight is VMEM-resident):
        # the weight block index is constant across i, so it is DMA'd exactly once.
        kernel = _make_simple_kernel(activation, compute_dtype)
        grid_spec = pltpu.PrefetchScalarGridSpec(
            num_scalar_prefetch=0,
            grid=(m_grid, n_grid),
            in_specs=[
                pl.BlockSpec((tile_b, IN), lambda i, j: (i, 0)),     # x tile
                pl.BlockSpec((IN, tile_n), lambda i, j: (0, j)),     # weight (resident if n_grid==1)
                pl.BlockSpec((1, tile_n), lambda i, j: (0, j)),      # bias
            ],
            out_specs=pl.BlockSpec((tile_b, tile_n), lambda i, j: (i, j)),
        )
        dim_sem = ("parallel", "parallel")
    else:
        kernel = _make_acc_kernel(activation, compute_dtype)
        grid_spec = pltpu.PrefetchScalarGridSpec(
            num_scalar_prefetch=0,
            grid=(m_grid, n_grid, k_grid),
            in_specs=[
                pl.BlockSpec((tile_b, tile_k), lambda i, j, k: (i, k)),
                pl.BlockSpec((tile_k, tile_n), lambda i, j, k: (k, j)),
                pl.BlockSpec((1, tile_n), lambda i, j, k: (0, j)),
            ],
            out_specs=pl.BlockSpec((tile_b, tile_n), lambda i, j, k: (i, j)),
            scratch_shapes=[pltpu.VMEM((tile_b, tile_n), jnp.float32)],
        )
        dim_sem = ("parallel", "parallel", "arbitrary")

    out = pl.pallas_call(
        kernel,
        out_shape=jax.ShapeDtypeStruct((B, OUT_PAD), out_dtype),
        grid_spec=grid_spec,
        compiler_params=pltpu.CompilerParams(
            dimension_semantics=dim_sem,
            vmem_limit_bytes=vmem_limit,
        ),
        cost_estimate=cost,
    )(x_in, w_t, b2)

    # Only strip real lane padding (a slice is an extra HBM pass over the output).
    if OUT_PAD == out_features:
        return out
    return out[:, :out_features]


def init_fc_params(key, in_features, out_features, dtype=jnp.float32):
    """Deterministic init mirroring torch.nn.Linear default (uniform +/- 1/sqrt(in))."""
    kw, kb = jax.random.split(key)
    bound = 1.0 / math.sqrt(in_features)
    weight = jax.random.uniform(kw, (out_features, in_features), dtype,
                                minval=-bound, maxval=bound)
    bias = jax.random.uniform(kb, (out_features,), dtype,
                              minval=-bound, maxval=bound)
    return weight, bias


if __name__ == "__main__":
    # fc_module(layer_params=[32, 64], activation='tanh', dropout_rate=0.0)
    IN_F, OUT_F = 32, 64
    BATCH = 8

    key = jax.random.PRNGKey(0)
    kx, kp = jax.random.split(key)
    x = jax.random.normal(kx, (BATCH, IN_F), jnp.float32)
    weight, bias = init_fc_params(kp, IN_F, OUT_F)

    # One-time parameter prep (transpose + lane-pad + bf16) — not in the hot path.
    w_t, b2, out_f = prepare_fc_params(weight, bias)

    out = fc_module_forward(x, w_t, b2, out_f, activation="tanh")
    out = jax.block_until_ready(out)
    assert out.shape == (BATCH, OUT_F)

    # Tight check against a reference using the same bf16 operand rounding.
    xb = x.astype(jnp.bfloat16).astype(jnp.float32)
    wb = weight.T.astype(jnp.bfloat16).astype(jnp.float32)
    ref_bf16 = jnp.tanh(xb @ wb + bias)
    # Coarse check against the exact f32 PyTorch-equivalent reference.
    ref_f32 = jnp.tanh(x @ weight.T + bias)

    assert jnp.allclose(out, ref_bf16, atol=1e-3, rtol=1e-3)
    assert jnp.allclose(out, ref_f32, atol=2e-2, rtol=2e-2)

    print("KERNEL_OK")
</pallas_src>

<mosaic_0001>
module attributes {stable_mosaic.version = 11 : i64} {
  func.func @kernel(%arg0: i32, %arg1: i32, %arg2: memref<8x32xf32, #tpu.memory_space<vmem>>, %arg3: memref<32x128xbf16, #tpu.memory_space<vmem>>, %arg4: memref<1x128xf32, #tpu.memory_space<vmem>>, %arg5: memref<8x128xf32, #tpu.memory_space<vmem>>) attributes {dimension_semantics = [#tpu.dimension_semantics<parallel>, #tpu.dimension_semantics<parallel>], iteration_bounds = array<i64: 1, 1>, scalar_prefetch = 0 : i64, scratch_operands = 0 : i64, tpu.core_type = #tpu.core_type<tc>, window_params = [{transform_indices = @transform_0, window_bounds = array<i64: 8, 32>}, {transform_indices = @transform_1, window_bounds = array<i64: 32, 128>}, {transform_indices = @transform_2, window_bounds = array<i64: 1, 128>}, {transform_indices = @transform_3, window_bounds = array<i64: 8, 128>}]} {
    %c0 = arith.constant 0 : index
    %c0_0 = arith.constant 0 : index
    %0 = vector.load %arg2[%c0, %c0_0] : memref<8x32xf32, #tpu.memory_space<vmem>>, vector<8x32xf32>
    %1 = arith.truncf %0 : vector<8x32xf32> to vector<8x32xbf16>
    %c0_1 = arith.constant 0 : index
    %c0_2 = arith.constant 0 : index
    %2 = vector.load %arg3[%c0_1, %c0_2] : memref<32x128xbf16, #tpu.memory_space<vmem>>, vector<32x128xbf16>
    %cst = arith.constant dense<0.000000e+00> : vector<8x128xf32>
    %3 = tpu.matmul %1, %2, %cst {dimension_numbers = #tpu.dot_dimension_numbers<[1], [0], [0], [1], [0, 0, 1, 1], [], []>} : vector<8x32xbf16>, vector<32x128xbf16>, vector<8x128xf32> -> vector<8x128xf32>
    %c0_3 = arith.constant 0 : index
    %c0_4 = arith.constant 0 : index
    %4 = vector.load %arg4[%c0_3, %c0_4] : memref<1x128xf32, #tpu.memory_space<vmem>>, vector<1x128xf32>
    %5 = vector.broadcast %4 : vector<1x128xf32> to vector<8x128xf32>
    %6 = arith.addf %3, %5 : vector<8x128xf32>
    %7 = math.tanh %6 : vector<8x128xf32>
    %c0_5 = arith.constant 0 : index
    %c0_6 = arith.constant 0 : index
    %8 = vector.load %arg5[%c0_5, %c0_6] : memref<8x128xf32, #tpu.memory_space<vmem>>, vector<8x128xf32>
    tpu.vector_store %arg5[%c0_5, %c0_6], %7 {strides = array<i32>} : memref<8x128xf32, #tpu.memory_space<vmem>>, vector<8x128xf32>,
    return
  }
  func.func @transform_0(%arg0: i32, %arg1: i32) -> (i32, i32) {
    %c0_i32 = arith.constant 0 : i32
    %c0_i32_0 = arith.constant 0 : i32
    return %arg0, %c0_i32 : i32, i32
  }
  func.func @transform_1(%arg0: i32, %arg1: i32) -> (i32, i32) {
    %c0_i32 = arith.constant 0 : i32
    %c0_i32_0 = arith.constant 0 : i32
    return %c0_i32, %arg1 : i32, i32
  }
  func.func @transform_2(%arg0: i32, %arg1: i32) -> (i32, i32) {
    %c0_i32 = arith.constant 0 : i32
    %c0_i32_0 = arith.constant 0 : i32
    return %c0_i32, %arg1 : i32, i32
  }
  func.func @transform_3(%arg0: i32, %arg1: i32) -> (i32, i32) {
    %c0_i32 = arith.constant 0 : i32
    return %arg0, %arg1 : i32, i32
  }
}

</mosaic_0001>

<bundles_post_ra>
// kernel: tpu_custom_call.1
= control target key start
LH: loop header
LB: loop body
LE: loop exit
PB: predicated region body
PF: predicated region fallthrough
CT: control target
= control target key end

     0   :  { %8 = vsyncpa [#allocation3], 0  ;;  %s300_s0 = inlined_call_operand.hbm [shape: f32[8,32], index: 0, kind: input, shape index: {}]   ;;  %s301_s1 = inlined_call_operand.hbm [shape: bf16[32,128], index: 1, kind: input, shape index: {}]   ;;  %s302_s2 = inlined_call_operand.vmem [shape: f32[1,128], index: 2, kind: input, shape index: {}]   ;;  %s303_s3 = inlined_call_operand.hbm [shape: f32[8,128], index: 3, kind: output, shape index: {}]  }
   0x1   :  { %9 = vsyncpa [#allocation6], 0 }
   0x2   :  { %10 = vsyncpa [#allocation4], 0  ;;  %s227_s12 = smov [#allocation2]   ;;  %s228_s14 = smov [#allocation5]  }
   0x3   :  { %s17_s13 = sshll.u32 %s227_s12, 4  ;;  %s26_s15 = sshll.u32 %s228_s14, 4  ;;  %s18_s13 = int_to_ptr.vmem [resolvable:$true] %s17_s13  ;;  %s254_s15 = int_to_ptr.vmem [resolvable:$true] %s26_s15 }
   0x4   :  { %s155_s18 = scalar_lea.hbm %s300_s0, 128 }
   0x5   :  { %p156_p0 = scmp.ne.s32.totalorder %s300_s0, %s155_s18  ;;  %p159_p1 = scmp.lt.u32.totalorder %s155_s18, %s300_s0 }
   0x7   :  { %p161_p2 = pnand %p159_p1, %p156_p0 }
   0x9   :  { %164 = shalt.err (!%p161_p2)
}
   0xa   :  { %s165_s23 = scalar_lea.vmem %s18_s13, 128  ;;  %p170_p4 = scmp.lt.s32.totalorder %s18_s13, %s18_s13 }
   0xb   :  { %p166_p3 = scmp.ne.s32.totalorder %s18_s13, %s165_s23  ;;  %p171_p5 = scmp.lt.s32.totalorder %s165_s23, %s165_s23 }
   0xd   :  { %p172_p6 = por %p171_p5, %p170_p4 }
   0xf   :  { %p173_p7 = pnand %p172_p6, %p166_p3 }
  0x11   :  { %176 = shalt.err (!%p173_p7)
}
  0x12   :  { %20 = dma.hbm_to_vmem [thread:$0]  %s300_s0, 128, %s18_s13, [#allocation3]  }
  0x13   :  { %s177_s28 = scalar_lea.hbm %s301_s1, 256 }
  0x14   :  { %p178_p8 = scmp.ne.s32.totalorder %s301_s1, %s177_s28  ;;  %p181_p9 = scmp.lt.u32.totalorder %s177_s28, %s301_s1 }
  0x16   :  { %p183_p10 = pnand %p181_p9, %p178_p8 }
  0x18   :  { %186 = shalt.err (!%p183_p10)
}
  0x19   :  { %s187_s6 = scalar_lea.vmem %s254_s15, 256  ;;  %p192_p12 = scmp.lt.s32.totalorder %s254_s15, %s254_s15 }
  0x1a   :  { %p188_p11 = scmp.ne.s32.totalorder %s254_s15, %s187_s6  ;;  %p193_p13 = scmp.lt.s32.totalorder %s187_s6, %s187_s6 }
  0x1c   :  { %p194_p0 = por %p193_p13, %p192_p12 }
  0x1e   :  { %p195_p1 = pnand %p194_p0, %p188_p11 }
  0x20   :  { %198 = shalt.err (!%p195_p1)
}
  0x21   :  { %s229_s0 = smov 64   ;;  %s230_s7 = smov 4  }
  0x22   :  { %32 = dma.hbm_to_vmem [thread:$0]  %s301_s1, 256, %s254_s15, [#allocation6], %s229_s0, %s229_s0, %s230_s7  }
  0x23   :  { %221 = dma.done.wait [#allocation3], 128  }
  0x24   :  { %222 = vsyncadd [#allocation3], 4294967168 }
  0x25   :  { %223 = dma.done.wait [#allocation6], 256  }
  0x26   :  { %224 = vsyncadd [#allocation6], 4294967040  ;;  %v231_v0 = vmov 0.0   ;;  %vm232_vm0 = vmmov 0   ;;  %v151_v1 = vld [vmem:[#allocation5] sm:$0xff]   ;;  %v152_v2 = vld [vmem:[#allocation5 + $0x8] sm:$0xff]  }
  0x27   :  { %136 = vmatprep.subr.bf16.mxu0 %v231_v0  ;;  %140 = vmatprep.mubr.msk.bf16.mxu0 %vm232_vm0, %v231_v0  ;;  %v42_v3 = vld [vmem:[#allocation2] sm:$0xff]  ;;  %vm67_vm1 = vcmask 261120   ;;  %s233_s1 = smov [#allocation7]  }
  0x28   :  { %137 = vmatpush3.bf16.msra.mxu0 %v151_v1  ;;  %v43_v4 = vpack.c.bf16 %v42_v3, %v42_v3  ;;  %v129_v5 = vld [vmem:[%s302_s2] ss:$0 sm:$0xff]  ;;  %s119_s12 = sshll.u32 %s233_s1, 4  ;;  %s120_s12 = int_to_ptr.vmem [resolvable:$true] %s119_s12 }
  0x29   :  { %138 = vmatprep.subr.bf16.mxu0 %v231_v0  ;;  %s199_s13 = scalar_lea.vmem %s120_s12, 128  ;;  %p204_p3 = scmp.lt.s32.totalorder %s120_s12, %s120_s12 }
  0x2a   :  { %p200_p2 = scmp.ne.s32.totalorder %s120_s12, %s199_s13  ;;  %p205_p4 = scmp.lt.s32.totalorder %s199_s13, %s199_s13 }
  0x2c   :  { %139 = vmatpush3.bf16.msra.mxu0 %v152_v2  ;;  %p206_p5 = por %p205_p4, %p204_p3 }
  0x2e   :  { %p207_p6 = pnand %p206_p5, %p200_p2 }
  0x2f   :  { %141 = vmatmul.mubr.msk.bf16.vlgmr.msra.gmra.mrb[0].mxu0 %vm67_vm1, %v43_v4 }
 0x102   :  { %v105_v6 = vpop.f32.mrb[0].mxu0 }
 0x103   :  { %v106_v7 = vadd.f32 %v129_v5, %v105_v6  ;;  %v142_v8 = vpop.f32.mrb[1].mxu0 }
 0x104   :  { %v108_v9 = vpop.f32.mrb[2].mxu0 }
 0x105   :  { %153 = vtanh.f32 %v106_v7  ;;  %v143_v10 = vpop.f32.mrb[3].mxu0 }
 0x10f   :  { %v154_v11 = vpop.eup %153 }
 0x110   :  { %112 = vst [vmem:[#allocation7] sm:$0xff] %v154_v11 }
 0x111   :  { %210 = shalt.err (!%p207_p6)
}
 0x112   :  { %s211_s15 = scalar_lea.hbm %s303_s3, 128 }
 0x113   :  { %p212_p7 = scmp.ne.s32.totalorder %s303_s3, %s211_s15  ;;  %p215_p8 = scmp.lt.u32.totalorder %s211_s15, %s303_s3 }
 0x115   :  { %p217_p9 = pnand %p215_p8, %p212_p7 }
 0x117   :  { %220 = shalt.err (!%p217_p9)
}
 0x118   :  { %122 = dma.vmem_to_hbm [thread:$0]  %s120_s12, 128, %s303_s3, [#allocation4]  }
 0x119   :  { %225 = dma.done.wait [#allocation4], 128  }
 0x11a   :  { %226 = vsyncadd [#allocation4], 4294967168 }
 0x11b   :  { %126 = vsyncpa [#allocation3], 1 }
 0x11c   :  { %127 = vsyncpa [#allocation6], 1 }
 0x11d   :  { %128 = vsyncpa [#allocation4], 1 }

</bundles_post_ra>
